<compile_context>
chip_gen: v7x
topology: tpu7x:2x2x1
jax: 0.10.0
libtpu: 0.0.40
codegen_flags: <defaults>
</compile_context>

<pallas_src>
import jax
import jax.numpy as jnp
from jax.experimental import pallas as pl
from jax.experimental.pallas import tpu as pltpu


def _gain_bias_linear_kernel(x_ref, w_ref, lb_ref, g_ref, tb_ref, o_ref):
    # x_ref: (1, TS, Din)   w_ref: (Din, Dout)   lb_ref: (1, Dout)
    # g_ref / tb_ref: (1, 1, Dout)               o_ref: (1, TS, Dout)
    y = jnp.dot(x_ref[0], w_ref[...], preferred_element_type=jnp.float32)
    y = y + lb_ref[...]                       # nn.Linear bias
    o_ref[0] = (y * g_ref[0] + tb_ref[0]).astype(o_ref.dtype)


def _pick_seq_tile(S, Din, Dout, in_itemsize, budget_bytes=24 * 1024 * 1024):
    """Largest sequence tile that divides S, respects (8,128) tiling on the
    second-minor axis, and keeps the double-buffered working set in budget."""
    for ts in (1024, 512, 256, 128, 64, 32, 16, 8):
        if S % ts == 0:
            need = 2 * ts * Din * in_itemsize + 2 * ts * Dout * 4
            if need <= budget_bytes:
                return ts
    return S  # fall back to a single full-sequence block


def gain_bias_sinusoidal_linear(
    x, ts, w_lin_t, b_lin, w_gain_t, b_gain, w_bias_t, b_bias, *,
    time_embed_out_dim, rescale_timesteps, num_timesteps,
    compute_dtype=None,
):
    """Pallas implementation of GainBiasSinusoidalLinear.forward.

    x:        [B, S, input_dim]
    ts:       [B]
    w_lin_t:  [input_dim, output_dim]      (nn.Linear weight, pre-transposed once)
    b_lin:    [output_dim]
    w_gain_t: [time_embed_channels, output_dim]
    b_gain:   [output_dim]
    w_bias_t: [time_embed_channels, output_dim]
    b_bias:   [output_dim]
    compute_dtype: optionally cast x / w_lin_t (e.g. jnp.bfloat16 on v6e/v7x);
                   accumulation stays in f32.
    """
    B, S, Din = x.shape
    Dout = w_lin_t.shape[1]
    assert w_lin_t.shape[0] == Din, (w_lin_t.shape, Din)

    # ---- TimeStepEncoding + per-batch gain / bias (tiny glue, once per batch
    # row instead of once per token; the hot matmul stays in the kernel).
    ts_f = ts.astype(jnp.float32)
    if rescale_timesteps:
        ts_f = ts_f * (1000.0 / num_timesteps)
    inv_freq = 1.0 / (10000.0 ** (
        jnp.arange(0, time_embed_out_dim, 2, dtype=jnp.float32)
        / time_embed_out_dim))
    sin_inp = ts_f[:, None] * inv_freq[None, :]
    emb = jnp.concatenate([jnp.sin(sin_inp), jnp.cos(sin_inp)], axis=-1)  # [B, Tenc]
    assert emb.shape[-1] == w_gain_t.shape[0], (emb.shape, w_gain_t.shape)
    assert emb.shape[-1] == w_bias_t.shape[0], (emb.shape, w_bias_t.shape)

    gain = (emb @ w_gain_t.astype(jnp.float32)
            + b_gain.astype(jnp.float32)).reshape(B, 1, Dout)
    tbias = (emb @ w_bias_t.astype(jnp.float32)
             + b_bias.astype(jnp.float32)).reshape(B, 1, Dout)
    lbias = b_lin.reshape(1, Dout).astype(jnp.float32)

    if compute_dtype is not None:
        x = x.astype(compute_dtype)
        w_lin_t = w_lin_t.astype(compute_dtype)

    # ---- tile the sequence axis; weight stays resident across the grid.
    TS = _pick_seq_tile(S, Din, Dout, x.dtype.itemsize)
    grid = (B, S // TS)

    # Double-buffered x/out tiles + resident weight + small per-batch vectors.
    vmem_est = (2 * TS * Din * x.dtype.itemsize
                + 2 * TS * Dout * 4
                + 2 * Din * Dout * w_lin_t.dtype.itemsize
                + 8 * Dout * 4)
    vmem_limit = int(min(max(2 * vmem_est, 16 * 1024 * 1024), 48 * 1024 * 1024))

    out = pl.pallas_call(
        _gain_bias_linear_kernel,
        out_shape=jax.ShapeDtypeStruct((B, S, Dout), jnp.float32),
        grid=grid,
        in_specs=[
            pl.BlockSpec((1, TS, Din), lambda b, s: (b, s, 0)),   # x tile
            pl.BlockSpec((Din, Dout), lambda b, s: (0, 0)),       # weight (resident)
            pl.BlockSpec((1, Dout), lambda b, s: (0, 0)),         # linear bias (resident)
            pl.BlockSpec((1, 1, Dout), lambda b, s: (b, 0, 0)),   # per-batch gain
            pl.BlockSpec((1, 1, Dout), lambda b, s: (b, 0, 0)),   # per-batch time bias
        ],
        out_specs=pl.BlockSpec((1, TS, Dout), lambda b, s: (b, s, 0)),
        compiler_params=pltpu.CompilerParams(
            dimension_semantics=("parallel", "parallel"),
            vmem_limit_bytes=vmem_limit,
        ),
    )(x, w_lin_t, lbias, gain, tbias)
    return out


def _reference(x, ts, w_lin, b_lin, w_gain, b_gain, w_bias, b_bias, *,
               time_embed_out_dim, rescale_timesteps, num_timesteps):
    """Pure-JAX reference mirroring the PyTorch forward (token-wise gain/bias)."""
    ts = ts.astype(jnp.float32)
    if rescale_timesteps:
        ts = ts * (1000.0 / num_timesteps)
    y = x @ w_lin.T + b_lin
    inv_freq = 1.0 / (10000.0 ** (
        jnp.arange(0, time_embed_out_dim, 2, dtype=jnp.float32)
        / time_embed_out_dim))
    sin_inp = ts[:, None] * inv_freq[None, :]
    emb = jnp.concatenate([jnp.sin(sin_inp), jnp.cos(sin_inp)], axis=-1)
    emb = jnp.broadcast_to(emb[:, None, :], x.shape[:-1] + (emb.shape[-1],))
    gain = emb @ w_gain.T + b_gain
    bias = emb @ w_bias.T + b_bias
    return y * gain + bias


if __name__ == "__main__":
    key = jax.random.PRNGKey(0)
    B, S = 2, 8
    input_dim, output_dim = 32, 64
    rescale_timesteps, num_timesteps = True, 1000

    # Module hyper-params (mirrors GainBiasSinusoidalLinear.__init__)
    time_embed_out_dim = max(input_dim, output_dim)               # TimeStepEncoding.out_dim
    time_embed_channels = int(-(-time_embed_out_dim // 2) * 2)    # ceil(out_dim/2)*2

    k1, k2, k3, k4, k5, k6, k7, k8 = jax.random.split(key, 8)
    x = jax.random.normal(k1, (B, S, input_dim), dtype=jnp.float32)
    ts = jax.random.randint(k2, (B,), 0, num_timesteps).astype(jnp.float32)

    # nn.Linear parameters in PyTorch layout: weight [out, in], bias [out]
    w_lin = 0.05 * jax.random.normal(k3, (output_dim, input_dim), dtype=jnp.float32)
    b_lin = 0.05 * jax.random.normal(k4, (output_dim,), dtype=jnp.float32)
    w_gain = 0.05 * jax.random.normal(k5, (output_dim, time_embed_channels), dtype=jnp.float32)
    b_gain = 0.05 * jax.random.normal(k6, (output_dim,), dtype=jnp.float32)
    w_bias = 0.05 * jax.random.normal(k7, (output_dim, time_embed_channels), dtype=jnp.float32)
    b_bias = 0.05 * jax.random.normal(k8, (output_dim,), dtype=jnp.float32)

    # Pre-transpose weights ONCE outside the hot path (per perf review).
    w_lin_t = jnp.transpose(w_lin)      # [Din, Dout]
    w_gain_t = jnp.transpose(w_gain)    # [Tenc, Dout]
    w_bias_t = jnp.transpose(w_bias)    # [Tenc, Dout]

    out = gain_bias_sinusoidal_linear(
        x, ts, w_lin_t, b_lin, w_gain_t, b_gain, w_bias_t, b_bias,
        time_embed_out_dim=time_embed_out_dim,
        rescale_timesteps=rescale_timesteps,
        num_timesteps=num_timesteps,
        compute_dtype=None,  # set jnp.bfloat16 on v6e/v7x for MXU-native inputs
    )
    out = jax.block_until_ready(out)

    ref = _reference(
        x, ts, w_lin, b_lin, w_gain, b_gain, w_bias, b_bias,
        time_embed_out_dim=time_embed_out_dim,
        rescale_timesteps=rescale_timesteps,
        num_timesteps=num_timesteps)

    assert out.shape == (B, S, output_dim), out.shape
    assert jnp.allclose(out, ref, atol=1e-4, rtol=1e-4), "mismatch vs reference"
    print("KERNEL_OK")
</pallas_src>

<mosaic_0001>
module attributes {stable_mosaic.version = 11 : i64} {
  func.func @_gain_bias_linear_kernel(%arg0: i32, %arg1: i32, %arg2: memref<1x8x32xf32, #tpu.memory_space<vmem>>, %arg3: memref<32x64xf32, #tpu.memory_space<vmem>>, %arg4: memref<1x64xf32, #tpu.memory_space<vmem>>, %arg5: memref<1x1x64xf32, #tpu.memory_space<vmem>>, %arg6: memref<1x1x64xf32, #tpu.memory_space<vmem>>, %arg7: memref<1x8x64xf32, #tpu.memory_space<vmem>>) attributes {dimension_semantics = [#tpu.dimension_semantics<parallel>, #tpu.dimension_semantics<parallel>], iteration_bounds = array<i64: 2, 1>, scalar_prefetch = 0 : i64, scratch_operands = 0 : i64, tpu.core_type = #tpu.core_type<tc>, window_params = [{transform_indices = @transform_0, window_bounds = array<i64: 1, 8, 32>}, {pipeline_mode = #tpu.pipeline_mode<synchronous>, transform_indices = @transform_1, window_bounds = array<i64: 32, 64>}, {pipeline_mode = #tpu.pipeline_mode<synchronous>, transform_indices = @transform_2, window_bounds = array<i64: 1, 64>}, {transform_indices = @transform_3, window_bounds = array<i64: 1, 1, 64>}, {transform_indices = @transform_4, window_bounds = array<i64: 1, 1, 64>}, {transform_indices = @transform_5, window_bounds = array<i64: 1, 8, 64>}]} {
    %c0 = arith.constant 0 : index
    %c0_0 = arith.constant 0 : index
    %c0_1 = arith.constant 0 : index
    %0 = vector.load %arg2[%c0, %c0_0, %c0_1] : memref<1x8x32xf32, #tpu.memory_space<vmem>>, vector<1x8x32xf32>
    %1 = vector.shape_cast %0 : vector<1x8x32xf32> to vector<8x32xf32>
    %c0_2 = arith.constant 0 : index
    %c0_3 = arith.constant 0 : index
    %2 = vector.load %arg3[%c0_2, %c0_3] : memref<32x64xf32, #tpu.memory_space<vmem>>, vector<32x64xf32>
    %cst = arith.constant dense<0.000000e+00> : vector<8x64xf32>
    %3 = tpu.matmul %1, %2, %cst {dimension_numbers = #tpu.dot_dimension_numbers<[1], [0], [0], [1], [0, 0, 1, 1], [], []>} : vector<8x32xf32>, vector<32x64xf32>, vector<8x64xf32> -> vector<8x64xf32>
    %c0_4 = arith.constant 0 : index
    %c0_5 = arith.constant 0 : index
    %4 = vector.load %arg4[%c0_4, %c0_5] : memref<1x64xf32, #tpu.memory_space<vmem>>, vector<1x64xf32>
    %5 = vector.broadcast %4 : vector<1x64xf32> to vector<8x64xf32>
    %6 = arith.addf %3, %5 : vector<8x64xf32>
    %c0_6 = arith.constant 0 : index
    %c0_7 = arith.constant 0 : index
    %c0_8 = arith.constant 0 : index
    %7 = vector.load %arg5[%c0_6, %c0_7, %c0_8] : memref<1x1x64xf32, #tpu.memory_space<vmem>>, vector<1x1x64xf32>
    %8 = vector.shape_cast %7 : vector<1x1x64xf32> to vector<1x64xf32>
    %9 = vector.broadcast %8 : vector<1x64xf32> to vector<8x64xf32>
    %10 = arith.mulf %6, %9 : vector<8x64xf32>
    %c0_9 = arith.constant 0 : index
    %c0_10 = arith.constant 0 : index
    %c0_11 = arith.constant 0 : index
    %11 = vector.load %arg6[%c0_9, %c0_10, %c0_11] : memref<1x1x64xf32, #tpu.memory_space<vmem>>, vector<1x1x64xf32>
    %12 = vector.shape_cast %11 : vector<1x1x64xf32> to vector<1x64xf32>
    %13 = vector.broadcast %12 : vector<1x64xf32> to vector<8x64xf32>
    %14 = arith.addf %10, %13 : vector<8x64xf32>
    %c0_12 = arith.constant 0 : index
    %c0_13 = arith.constant 0 : index
    %c0_14 = arith.constant 0 : index
    %15 = vector.load %arg7[%c0_12, %c0_13, %c0_14] : memref<1x8x64xf32, #tpu.memory_space<vmem>>, vector<1x8x64xf32>
    %16 = vector.shape_cast %15 : vector<1x8x64xf32> to vector<8x64xf32>
    %17 = vector.shape_cast %14 : vector<8x64xf32> to vector<1x8x64xf32>
    tpu.vector_store %arg7[%c0_12, %c0_13, %c0_14], %17 {strides = array<i32>} : memref<1x8x64xf32, #tpu.memory_space<vmem>>, vector<1x8x64xf32>,
    return
  }
  func.func @transform_0(%arg0: i32, %arg1: i32) -> (i32, i32, i32) {
    %c0_i32 = arith.constant 0 : i32
    %c0_i32_0 = arith.constant 0 : i32
    return %arg0, %arg1, %c0_i32 : i32, i32, i32
  }
  func.func @transform_1(%arg0: i32, %arg1: i32) -> (i32, i32) {
    %c0_i32 = arith.constant 0 : i32
    %c0_i32_0 = arith.constant 0 : i32
    %c0_i32_1 = arith.constant 0 : i32
    return %c0_i32, %c0_i32_0 : i32, i32
  }
  func.func @transform_2(%arg0: i32, %arg1: i32) -> (i32, i32) {
    %c0_i32 = arith.constant 0 : i32
    %c0_i32_0 = arith.constant 0 : i32
    %c0_i32_1 = arith.constant 0 : i32
    return %c0_i32, %c0_i32_0 : i32, i32
  }
  func.func @transform_3(%arg0: i32, %arg1: i32) -> (i32, i32, i32) {
    %c0_i32 = arith.constant 0 : i32
    %c0_i32_0 = arith.constant 0 : i32
    %c0_i32_1 = arith.constant 0 : i32
    return %arg0, %c0_i32, %c0_i32_0 : i32, i32, i32
  }
  func.func @transform_4(%arg0: i32, %arg1: i32) -> (i32, i32, i32) {
    %c0_i32 = arith.constant 0 : i32
    %c0_i32_0 = arith.constant 0 : i32
    %c0_i32_1 = arith.constant 0 : i32
    return %arg0, %c0_i32, %c0_i32_0 : i32, i32, i32
  }
  func.func @transform_5(%arg0: i32, %arg1: i32) -> (i32, i32, i32) {
    %c0_i32 = arith.constant 0 : i32
    %c0_i32_0 = arith.constant 0 : i32
    return %arg0, %arg1, %c0_i32 : i32, i32, i32
  }
}

</mosaic_0001>

<bundles_post_ra>
// kernel: tpu_custom_call.1
= control target key start
LH: loop header
LB: loop body
LE: loop exit
PB: predicated region body
PF: predicated region fallthrough
CT: control target
= control target key end

     0   :  { %10 = vsyncpa [#allocation3], 0  ;;  %s1059_s0 = inlined_call_operand.hbm [shape: f32[2,8,32], index: 0, kind: input, shape index: {}]   ;;  %s1060_s1 = inlined_call_operand.hbm [shape: f32[32,64], index: 1, kind: input, shape index: {}]   ;;  %s1061_s2 = inlined_call_operand.vmem [shape: f32[1,64], index: 2, kind: input, shape index: {}]   ;;  %s1062_s3 = inlined_call_operand.vmem [shape: f32[2,1,64], index: 3, kind: input, shape index: {}]   ;;  %s1063_s4 = inlined_call_operand.vmem [shape: f32[2,1,64], index: 4, kind: input, shape index: {}]   ;;  %s1064_s5 = inlined_call_operand.hbm [shape: f32[2,8,64], index: 5, kind: output, shape index: {}]  }
   0x1   :  { %12 = vsyncpa [#allocation3 + $0x1], 0 }
   0x2   :  { %13 = vsyncpa [#allocation6], 0 }
   0x3   :  { %14 = vsyncpa [#allocation4], 0 }
   0x4   :  { %16 = vsyncpa [#allocation4 + $0x1], 0  ;;  %s830_s18 = smov 0   ;;  %s832_s19 = smov 0  }
   0x5   :  { %s834_s20 = smov 0   ;;  %s836_s21 = smov 0  }
   0x6   :  { %s838_s22 = smov 0   ;;  %s840_s23 = smov 0  }
   0x7 LB: > { %s527_s24 = sadd.s32 4294967295, %s790_s23   ;;  %s528_s25 = sadd.s32 4294967294, %s790_s23   ;;  %s790_s23 = sphi %s840_s23, %s22_s23   ;;  %s786_s22 = sphi %s838_s22, %s1088_s22   ;;  %s782_s21 = sphi %s836_s21, %s1087_s21   ;;  %s778_s20 = sphi %s834_s20, %s1086_s20   ;;  %s774_s19 = sphi %s832_s19, %s1085_s19   ;;  %s770_s18 = sphi %s830_s18, %s1084_s18  }
   0x8   : > { %p56_p0 = scmp.ne.s32.totalorder %s774_s19, %s770_s18  ;;  %p864_p1 = scmp.eq.s32.totalorder %s527_s24, 0 }
   0x9   : > { %p868_p2 = scmp.eq.s32.totalorder %s527_s24, 1  ;;  %p182_p3 = scmp.eq.s32.totalorder %s528_s25, 1 }
   0xa   : > { %s1069_s26 = scalar_select %p864_p1, 1, 0 }
   0xb   : > { %s1070_s27 = scalar_select %p868_p2, 1, 0 }
   0xc   : > { %p874_p4 = por %p864_p1, %p56_p0  ;;  %p529_p5 = scmp.ge.s32.totalorder %s790_s23, 1 }
   0xd   : > { %p879_p6 = por %p182_p3, %p56_p0  ;;  %p189_p7 = scmp.lt.s32.totalorder %s790_s23, 3 }
   0xe   : > { %s1071_s28 = scalar_select %p874_p4, 1, 0 }
   0xf   : > { %s1072_s29 = scalar_select %p879_p6, 1, 0 }
  0x10   : > { %p884_p8 = pnand %p529_p5, %p189_p7  ;;  %s792_s6 = smov [#allocation5]  }
  0x11   : > { %s201_s7 = sshll.u32 %s792_s6, 4  ;;  %s34_s9 = sadd.s32 1, %s786_s22  ;;  %s202_s7 = int_to_ptr.vmem [resolvable:$true] %s201_s7 }
  0x12   : > { %s1073_s30 = scalar_select %p884_p8, 1, 0 }
  0x13   : > { %p576_p9 = pneg %p884_p8  ;;  %s646_s12 = scalar_lea.hbm %s1060_s1, 512 }
  0x14   : > { %p647_p12 = scmp.ne.s32.totalorder %s1060_s1, %s646_s12  ;;  %p653_p5 = scmp.lt.u32.totalorder %s646_s12, %s1060_s1 }
  0x15   : > { %p893_p11 = pnand %p576_p9, %p864_p1 }
  0x17   : > { %p648_p13 = pneg %p893_p11 }
  0x19   : > { %p649_p0 = pnand %p648_p13, %p647_p12 }
  0x1b   : > { %p650_p3 = pneg %p649_p0 }
  0x1d   : > { %p655_p7 = pnand %p653_p5, %p650_p3 }
  0x1f   : > { %658 = shalt.err (!%p655_p7)
}
  0x20   : > { %s659_s17 = scalar_lea.vmem %s202_s7, 512  ;;  %p667_p1 = scmp.lt.s32.totalorder %s202_s7, %s202_s7 }
  0x21   : > { %p660_p9 = scmp.ne.s32.totalorder %s202_s7, %s659_s17  ;;  %p668_p4 = scmp.lt.s32.totalorder %s659_s17, %s659_s17 }
  0x23   : > { %p662_p10 = pnand %p660_p9, %p648_p13  ;;  %p669_p8 = por %p668_p4, %p667_p1 }
  0x25   : > { %p663_p6 = pneg %p662_p10 }
  0x27   : > { %p670_p2 = pnand %p669_p8, %p663_p6 }
  0x29   : > { %673 = shalt.err (!%p670_p2)
}
  0x2a   : > { %s793_s24 = smov 128   ;;  %s794_s25 = smov 8  }
  0x2b   : > { %579 = dma.hbm_to_vmem [thread:$0]  (!%p893_p11), %s1060_s1, 512, %s202_s7, [#allocation6], %s793_s24, %s793_s24, %s794_s25  }
  0x2c   : > { %p36_p1 = scmp.ge.s32.totalorder %s34_s9, 2  ;;  %s43_s11 = sadd.s32 1, %s778_s20 }
  0x2d   : > { %p50_p2 = scmp.ne.s32.totalorder %s778_s20, %s774_s19  ;;  %p51_p4 = scmp.eq.s32.totalorder %s790_s23, 0 }
  0x2e   : > { %s1090_s9 = smov (%p36_p1, %s34_s9), 0  ;;  %p1076_p8 = scmp.ne.s32.totalorder %s1070_s27, 0 }
  0x2f   : > { %p920_p6 = por %p51_p4, %p50_p2  ;;  %s38_s8 = ssub.s32 %s786_s22, %s1090_s9 }
  0x30   : > { %p926_p10 = por %p1076_p8, %p50_p2  ;;  %p589_p12 = scmp.lt.s32.totalorder %s790_s23, 2 }
  0x31   : > { %p41_p11 = scmp.eq.s32.totalorder %s38_s8, 0  ;;  %s218_s7 = sand.u32 1, %s778_s20  }
  0x32   : > { %s532_s14 = sshll.u32 %s218_s7, 3  ;;  %s533_s16 = sshll.u32 %s786_s22, 7 }
  0x33   : > { %s935_s15 = scalar_select %p41_p11, %s778_s20, %s43_s11  }
  0x34   : > { %s941_s25 = scalar_lea.hbm %s1059_s0, %s533_s16  ;;  %s222_s27 = scalar_lea.vmem [#allocation2], %s532_s14 }
  0x35   : > { %s230_s6 = sshll.u32 %s222_s27, 4  ;;  %p947_p13 = pnand %p589_p12, %p920_p6  ;;  %s943_s6 = int_to_ptr.vmem [resolvable:$true] %s230_s6 }
  0x36   : > { %s219_s11 = scalar_lea.sflag [#allocation3], %s218_s7  ;;  %s674_s8 = scalar_lea.hbm %s941_s25, 128 }
  0x37   : > { %p675_p0 = scmp.ne.s32.totalorder %s941_s25, %s674_s8  ;;  %p676_p3 = pneg %p947_p13 }
  0x38   : > { %s679_s17 = scalar_lea.hbm %s1059_s0, 256  ;;  %p680_p9 = scmp.lt.u32.totalorder %s941_s25, %s1059_s0 }
  0x39   : > { %p677_p5 = pnand %p676_p3, %p675_p0  ;;  %p681_p1 = scmp.lt.u32.totalorder %s679_s17, %s674_s8 }
  0x3a   : > { %p683_p4 = scmp.lt.u32.totalorder %s674_s8, %s941_s25 }
  0x3b   : > { %p678_p7 = pneg %p677_p5  ;;  %p682_p2 = por %p681_p1, %p680_p9 }
  0x3d   : > { %p684_p6 = por %p683_p4, %p682_p2 }
  0x3f   : > { %p685_p8 = pnand %p684_p6, %p678_p7 }
  0x41   : > { %688 = shalt.err (!%p685_p8)
}
  0x42   : > { %s689_s7 = scalar_lea.vmem %s943_s6, 128  ;;  %s795_s27 = smov [#allocation2]  }
  0x43   : > { %p690_p12 = scmp.ne.s32.totalorder %s943_s6, %s689_s7  ;;  %s694_s14 = sshll.u32 %s795_s27, 4  ;;  %s695_s14 = int_to_ptr.vmem [resolvable:$false] %s694_s14 }
  0x44   : > { %s696_s16 = scalar_lea.vmem %s695_s14, 256  ;;  %p697_p5 = scmp.lt.s32.totalorder %s943_s6, %s695_s14 }
  0x45   : > { %p692_p11 = pnand %p690_p12, %p676_p3  ;;  %p698_p9 = scmp.lt.s32.totalorder %s696_s16, %s689_s7 }
  0x47   : > { %p693_p0 = pneg %p692_p11  ;;  %p699_p1 = por %p698_p9, %p697_p5 }
  0x49   : > { %p700_p2 = pnand %p699_p1, %p693_p0 }
  0x4b   : > { %703 = shalt.err (!%p700_p2)
}
  0x4c   : > { %583 = dma.hbm_to_vmem [thread:$0]  (!%p947_p13), %s941_s25, 128, %s943_s6, %s219_s11  }
  0x4d   : > { %p1079_p7 = scmp.ne.s32.totalorder %s1073_s30, 0 }
  0x4e   : > { %s979_s8 = sand.u32 (!%p1079_p7), 1, %s774_s19   ;;  %p1080_p3 = scmp.ne.s32.totalorder (!%p1079_p7), %s1071_s28, 0 }
  0x4f   : > { %251 = sbr.rel (%p1079_p7) target bundleno = 333 (0x14d), region = 40  ;;  %s535_s17 = sshll.u32 (!%p1079_p7), %s979_s8, 3 }
  0x50   : > { %s254_s12 = scalar_lea.sflag (!%p1079_p7), [#allocation3], %s979_s8  ;;  %s257_s24 = scalar_lea.vmem (!%p1079_p7), [#allocation2], %s535_s17 }
  0x56   : > { %757 = dma.done.wait (%p1080_p3), %s254_s12, 128  }
  0x57   : > { %759 = vsyncadd (%p1080_p3), %s254_s12, 4294967168  ;;  %p1081_p13 = scmp.ne.s32.totalorder %s1069_s26, 0 }
  0x59   : > { %761 = dma.done.wait (%p1081_p13), [#allocation6], 512  }
  0x5a   : > { %763 = vsyncadd (%p1081_p13), [#allocation6], 4294966784  ;;  %v796_v0 = vmov 0.0|0.0   ;;  %vm797_vm0 = vmmov 0   ;;  %v798_v1 = vmov 0.0   ;;  %v301_v2 = vld [vmem:[#allocation5] sm:$0xff] }
  0x5b   : > { %562 = vmatprep.subr.bf16.mxu0 %v796_v0  ;;  %559 = vmatprep.mubr.msk.f32.mxu0 %vm797_vm0, %v798_v1  ;;  %v302_v3 = vld [vmem:[#allocation5 + $0x8] sm:$0xff]  ;;  %v303_v4 = vld [vmem:[#allocation5 + $0x10] sm:$0xff]  ;;  %v304_v6 = vld [vmem:[#allocation5 + $0x18] sm:$0xff]  ;;  %vm312_vm1 = vcmask 261120   ;;  %p294_p4 = scmp.lt.s32.totalorder %s782_s21, 1  ;;  %s543_s14 = sshll.u32 %s782_s21, 7 }
  0x5c   : > { %v563_v5 = vpack.c.bf16 %v302_v3, %v301_v2  ;;  %v566_v7 = vpack.c.bf16 %v304_v6, %v303_v4  ;;  %v300_v8 = vld [vmem:[%s257_s24] sm:$0xff]  ;;  %s293_s16 = scalar_lea.vmem [#allocation7], %s535_s17  ;;  %vm402_vm2 = vcmask 523264   ;;  %s1010_s30 = scalar_lea.hbm %s1064_s5, %s543_s14 }
  0x5d   : > { %s295_s26 = scalar_select %p294_p4, %s782_s21, 1  ;;  %v538_v9 = vld [vmem:[%s1061_s2] ss:$0 sm:$0xff] }
  0x5e   : > { %564 = vmatpush3.bf16.msra.mxu0 %v563_v5  ;;  %s419_s12 = sshll.u32 %s293_s16, 4  ;;  %s799_s21 = smov [#allocation7]   ;;  %s1012_s12 = int_to_ptr.vmem [resolvable:$true] %s419_s12 }
  0x5f   : > { %565 = vmatprep.subr.bf16.mxu0 %v796_v0  ;;  %s296_s25 = scalar_lea.vmem %s1062_s3, %s295_s26  ;;  %s299_s27 = scalar_lea.vmem %s1063_s4, %s295_s26 }
  0x60   : > { %v540_v11 = vld [vmem:[%s296_s25] ss:$0 sm:$0xff]  ;;  %s405_s26 = scalar_lea.sflag [#allocation4], %s979_s8  ;;  %s704_s25 = scalar_lea.vmem %s1012_s12, 128 }
  0x61   : > { %v541_v14 = vld [vmem:[%s299_s27] ss:$0 sm:$0xff]  ;;  %p705_p6 = scmp.ne.s32.totalorder %s1012_s12, %s704_s25  ;;  %s708_s17 = sshll.u32 %s799_s21, 4  ;;  %s709_s17 = int_to_ptr.vmem [resolvable:$false] %s708_s17 }
  0x62   : > { %567 = vmatpush3.bf16.msra.mxu0 %v566_v7  ;;  %s710_s6 = scalar_lea.vmem %s709_s17, 256  ;;  %p711_p11 = scmp.lt.s32.totalorder %s1012_s12, %s709_s17 }
  0x63   : > { %p706_p8 = pnand %p705_p6, %p926_p10  ;;  %p712_p0 = scmp.lt.s32.totalorder %s710_s6, %s704_s25 }
  0x65   : > { %560 = vmatmul.mubr.msk.f32.vlgmr.msra.gmra.mrb[0].mxu0 %vm312_vm1, %v300_v8  ;;  %p707_p12 = pneg %p706_p8  ;;  %p713_p5 = por %p712_p0, %p711_p11 }
  0x67   : > { %p714_p9 = pnand %p713_p5, %p707_p12 }
 0x138   : > { %v382_v10 = vpop.f32.mrb[0].mxu0 }
 0x139   : > { %v383_v12 = vadd.f32 %v538_v9, %v382_v10  ;;  %v561_v13 = vpop.f32.mrb[1].mxu0 }
 0x13b   : > { %v393_v15 = vmul.f32 %v540_v11, %v383_v12 }
 0x13d   : > { %v401_v16 = vadd.f32 %v541_v14, %v393_v15 }
 0x13f   : > { %403 = vst.msk [vmem:[%s293_s16] sm:$0xff] %vm402_vm2, %v401_v16 }
 0x140   : > { %717 = shalt.err (!%p714_p9)
}
 0x141   : > { %s718_s8 = scalar_lea.hbm %s1010_s30, 128  ;;  %s722_s7 = scalar_lea.hbm %s1064_s5, 256 }
 0x142   : > { %p719_p1 = scmp.ne.s32.totalorder %s1010_s30, %s718_s8  ;;  %p723_p3 = scmp.lt.u32.totalorder %s1010_s30, %s1064_s5 }
 0x143   : > { %p724_p13 = scmp.lt.u32.totalorder %s722_s7, %s718_s8  ;;  %p726_p6 = scmp.lt.u32.totalorder %s718_s8, %s1010_s30 }
 0x144   : > { %p720_p2 = pnand %p719_p1, %p926_p10 }
 0x145   : > { %p725_p4 = por %p724_p13, %p723_p3 }
 0x146   : > { %p721_p7 = pneg %p720_p2 }
 0x147   : > { %p727_p8 = por %p726_p6, %p725_p4 }
 0x149   : > { %p728_p12 = pnand %p727_p8, %p721_p7 }
 0x14b   : > { %731 = shalt.err (!%p728_p12)
}
 0x14c   : > { %574 = dma.vmem_to_hbm [thread:$0]  (%p926_p10), %s1012_s12, 128, %s1010_s30, %s405_s26  }
 0x14d PF: > { %s431_s16 = sand.u32 1, %s770_s18   ;;  %p1082_p11 = scmp.ne.s32.totalorder %s1072_s29, 0 }
 0x14e   : > { %p1083_p0 = scmp.ge.s32.totalorder %s790_s23, 2  ;;  %s432_s24 = scalar_lea.sflag [#allocation4], %s431_s16 }
 0x150   : > { %p585_p5 = pnand %p1083_p0, %p1082_p11 }
 0x152   : > { %765 = dma.done.wait (!%p585_p5), %s432_s24, 128  }
 0x153   : > { %767 = vsyncadd (!%p585_p5), %s432_s24, 4294967168  ;;  %s22_s23 = sadd.s32 1, %s790_s23   ;;  %s1084_s18 = smov %s774_s19 }
 0x154   : > { %p19_p9 = scmp.ge.s32.totalorder %s22_s23, 4   ;;  %s1085_s19 = smov %s778_s20 }
 0x155   : > { %s1086_s20 = smov %s935_s15  ;;  %s1087_s21 = smov %s786_s22 }
 0x156   : > { %s1088_s22 = smov %s1090_s9  ;;  %21 = sbr.rel (!%p19_p9) target bundleno = 7 (0x7), region = 95 }
 0x15d   :  { %437 = vsyncpa [#allocation3], 1 }
 0x15e   :  { %439 = vsyncpa [#allocation3 + $0x1], 1 }
 0x15f   :  { %440 = vsyncpa [#allocation6], 1 }
 0x160   :  { %441 = vsyncpa [#allocation4], 1 }
 0x161   :  { %443 = vsyncpa [#allocation4 + $0x1], 1 }

</bundles_post_ra>
